<compile_context>
chip_gen: v7x
topology: tpu7x:2x2x1
jax: 0.10.0
libtpu: 0.0.40
codegen_flags: <defaults>
</compile_context>

<pallas_src>
import functools

import jax
import jax.numpy as jnp
from jax import lax
from jax.experimental import pallas as pl
from jax.experimental.pallas import tpu as pltpu


# ---------------------------------------------------------------------------
# Pallas kernels: fused matmul + per-column scale/bias (+ residual) (+ ReLU)
# ---------------------------------------------------------------------------
def _matmul_kernel(a_ref, b_ref, sb_ref, o_ref, *, act):
    acc = jnp.dot(a_ref[...], b_ref[...], preferred_element_type=jnp.float32)
    out = acc * sb_ref[0:1, :] + sb_ref[1:2, :]
    if act == "relu":
        out = jnp.maximum(out, 0.0)
    o_ref[...] = out.astype(o_ref.dtype)


def _matmul_residual_kernel(a_ref, b_ref, sb_ref, r_ref, o_ref, *, act):
    acc = jnp.dot(a_ref[...], b_ref[...], preferred_element_type=jnp.float32)
    out = acc * sb_ref[0:1, :] + sb_ref[1:2, :] + r_ref[...].astype(jnp.float32)
    if act == "relu":
        out = jnp.maximum(out, 0.0)
    o_ref[...] = out.astype(o_ref.dtype)


@functools.partial(jax.jit, static_argnames=("act", "out_dtype"))
def matmul_fused(a, b, sb, residual=None, *, act="none", out_dtype=jnp.bfloat16):
    """a: (M, K) bf16, b: (K, N) bf16, sb: (2, N) f32 = [scale; bias].

    Returns act((a @ b) * scale + bias [+ residual]) with f32 accumulation.
    K is never tiled (single full-depth block), so no K padding is needed and
    the epilogue runs unconditionally.  M/N edge blocks are handled by Pallas
    boundary masking, so no M/N padding copies either.
    """
    M, K = a.shape
    Kb, N = b.shape
    assert K == Kb
    # Block dims must be multiples of (8, 128) or equal to the full array dim.
    tm = 256 if M >= 256 else M
    tn = 256 if N >= 256 else N
    grid = (pl.cdiv(M, tm), pl.cdiv(N, tn))

    in_specs = [
        pl.BlockSpec((tm, K), lambda i, j: (i, 0)),   # A row-block, full K
        pl.BlockSpec((K, tn), lambda i, j: (0, j)),   # B col-block, full K
        pl.BlockSpec((2, tn), lambda i, j: (0, j)),   # [scale; bias]
    ]
    operands = [a, b, sb]
    if residual is not None:
        in_specs.append(pl.BlockSpec((tm, tn), lambda i, j: (i, j)))
        operands.append(residual)
        kernel = functools.partial(_matmul_residual_kernel, act=act)
    else:
        kernel = functools.partial(_matmul_kernel, act=act)

    return pl.pallas_call(
        kernel,
        out_shape=jax.ShapeDtypeStruct((M, N), out_dtype),
        grid_spec=pltpu.PrefetchScalarGridSpec(
            num_scalar_prefetch=0,
            grid=grid,
            in_specs=in_specs,
            out_specs=pl.BlockSpec((tm, tn), lambda i, j: (i, j)),
        ),
        compiler_params=pltpu.CompilerParams(
            dimension_semantics=("parallel", "parallel"),
            vmem_limit_bytes=32 * 1024 * 1024,
        ),
    )(*operands)


# ---------------------------------------------------------------------------
# Convolution = (reshape | im2col) -> fused Pallas matmul
# ---------------------------------------------------------------------------
def im2col(x, kh, kw, stride, pad):
    """x: NHWC bf16 -> (N*OH*OW, KH*KW*C) patch matrix (tap-major, c-minor)."""
    n, h, w, c = x.shape
    xp = jnp.pad(x, ((0, 0), (pad, pad), (pad, pad), (0, 0)))
    oh = (h + 2 * pad - kh) // stride + 1
    ow = (w + 2 * pad - kw) // stride + 1
    cols = []
    for i in range(kh):
        for j in range(kw):
            patch = lax.slice(
                xp, (0, i, j, 0),
                (n, i + (oh - 1) * stride + 1, j + (ow - 1) * stride + 1, c),
                (1, stride, stride, 1))
            cols.append(patch)
    patches = jnp.stack(cols, axis=3)                 # (n, oh, ow, kh*kw, c)
    return patches.reshape(n * oh * ow, kh * kw * c), oh, ow


@functools.partial(jax.jit, static_argnames=("kh", "kw", "stride", "pad", "act"))
def conv_bn(x, b_mat, sb, residual=None, *, kh, kw, stride, pad, act):
    """x: NHWC bf16; b_mat: (KH*KW*IC, OC) bf16 (pre-transposed at init);
    sb: (2, OC) f32 folded BN; optional residual (NHWC) fused into epilogue."""
    n, h, w, c = x.shape
    if kh == 1 and kw == 1:
        # 1x1 conv: im2col is a (strided) view + reshape, no patch duplication.
        if stride > 1:
            x = x[:, ::stride, ::stride, :]
        oh, ow = x.shape[1], x.shape[2]
        a = x.reshape(n * oh * ow, c)
    else:
        # TODO(synk): 3x3/7x7 convs still materialize the kh*kw-duplicated
        # im2col matrix; a direct tap-indexed Pallas conv would cut that
        # HBM traffic further.
        a, oh, ow = im2col(x, kh, kw, stride, pad)
    oc = b_mat.shape[1]
    r = None if residual is None else residual.reshape(n * oh * ow, oc)
    y = matmul_fused(a, b_mat, sb, r, act=act, out_dtype=jnp.bfloat16)
    return y.reshape(n, oh, ow, oc)


def maxpool_3x3_s2_p1(x):
    # TODO(synk): max-pool kept as lax.reduce_window glue (not the hot path).
    return lax.reduce_window(x, jnp.array(-jnp.inf, dtype=x.dtype), lax.max,
                             (1, 3, 3, 1), (1, 2, 2, 1),
                             [(0, 0), (1, 1), (1, 1), (0, 0)])


# ---------------------------------------------------------------------------
# Deterministic parameter init (pre-transformed, inference-ready layout)
# ---------------------------------------------------------------------------
ARCH = [(64, 3, 1), (128, 4, 2), (256, 6, 2), (512, 3, 2)]   # (planes, blocks, stride)


class KeyGen:
    def __init__(self, key):
        self.key = key

    def __call__(self):
        self.key, sub = jax.random.split(self.key)
        return sub


def init_conv_param(kg, oc, ic, kh, kw, eps=1e-5):
    """Conv weight (He init) + folded eval-mode BN -> ((KH*KW*IC, OC) bf16, (2, OC) f32)."""
    std = (2.0 / (ic * kh * kw)) ** 0.5
    w = jax.random.normal(kg(), (oc, ic, kh, kw), jnp.float32) * std
    b_mat = jnp.transpose(w, (2, 3, 1, 0)).reshape(kh * kw * ic, oc).astype(jnp.bfloat16)
    k1, k2, k3, k4 = jax.random.split(kg(), 4)
    gamma = jax.random.uniform(k1, (oc,), jnp.float32, 0.5, 1.5)
    beta = jax.random.normal(k2, (oc,), jnp.float32) * 0.1
    mean = jax.random.normal(k3, (oc,), jnp.float32) * 0.1
    var = jax.random.uniform(k4, (oc,), jnp.float32, 0.5, 1.5)
    scale = gamma / jnp.sqrt(var + eps)
    bias = beta - mean * scale
    return (b_mat, jnp.stack([scale, bias]))


def make_bottleneck(kg, inplanes, planes, stride):
    p = {
        "conv1": init_conv_param(kg, planes, inplanes, 1, 1),
        "conv2": init_conv_param(kg, planes, planes, 3, 3),
        "conv3": init_conv_param(kg, planes * 4, planes, 1, 1),
    }
    if stride != 1 or inplanes != planes * 4:
        p["ds"] = init_conv_param(kg, planes * 4, inplanes, 1, 1)
    return p


def make_quantized_resnet50(key):
    kg = KeyGen(key)
    params = {"stem": init_conv_param(kg, 64, 3, 7, 7), "layers": []}
    inplanes = 64
    for planes, blocks, stride in ARCH:
        layer = [make_bottleneck(kg, inplanes, planes, stride)]
        inplanes = planes * 4
        for _ in range(blocks - 1):
            layer.append(make_bottleneck(kg, inplanes, planes, 1))
        params["layers"].append(layer)

    # Final nn.Linear: this is the (only) module torch's dynamic quantization
    # actually converts.  Static per-tensor symmetric int8 weights; the int
    # values are stored in bf16 (exact for |q| <= 127) so the MXU does the
    # integer GEMM with f32 accumulation.
    std = (1.0 / 2048) ** 0.5
    w = jax.random.normal(kg(), (1000, 2048), jnp.float32) * std
    b = jax.random.normal(kg(), (1000,), jnp.float32) * std
    w_scale = jnp.maximum(jnp.max(jnp.abs(w)), 1e-8) / 127.0
    w_q = jnp.clip(jnp.round(w / w_scale), -127.0, 127.0)
    params["fc"] = {
        "wq_t": w_q.T.astype(jnp.bfloat16),          # (2048, 1000), pre-transposed
        "w_scale": w_scale.astype(jnp.float32),
        "bias": b,
    }
    return params


# ---------------------------------------------------------------------------
# Forward pass (ResNet-50, eval mode, dynamically quantized classifier)
# ---------------------------------------------------------------------------
def bottleneck_forward(x, p, stride):
    if "ds" in p:
        identity = conv_bn(x, *p["ds"], kh=1, kw=1, stride=stride, pad=0, act="none")
    else:
        identity = x
    out = conv_bn(x, *p["conv1"], kh=1, kw=1, stride=1, pad=0, act="relu")
    out = conv_bn(out, *p["conv2"], kh=3, kw=3, stride=stride, pad=1, act="relu")
    # Residual add + ReLU fused into conv3's matmul epilogue (no extra pass).
    out = conv_bn(out, *p["conv3"], identity, kh=1, kw=1, stride=1, pad=0, act="relu")
    return out


@jax.jit
def quantized_linear(x, fc):
    """Dynamic-quantized Linear: per-forward int8 activation quantization,
    int8-valued matmul, dequant (x_scale*w_scale) + bias in the Pallas epilogue."""
    x_scale = jnp.maximum(jnp.max(jnp.abs(x)), 1e-8) / 127.0
    x_q = jnp.clip(jnp.round(x / x_scale), -127.0, 127.0).astype(jnp.bfloat16)
    n_out = fc["wq_t"].shape[1]
    dequant = jnp.broadcast_to(x_scale * fc["w_scale"], (n_out,)).astype(jnp.float32)
    sb = jnp.stack([dequant, fc["bias"]])
    return matmul_fused(x_q, fc["wq_t"], sb, act="none", out_dtype=jnp.float32)


def quantized_resnet50_forward(params, x_nchw):
    # layout: x_nchw is NCHW (PyTorch); converted to NHWC bf16 for all kernels.
    x = jnp.transpose(x_nchw, (0, 2, 3, 1)).astype(jnp.bfloat16)
    x = conv_bn(x, *params["stem"], kh=7, kw=7, stride=2, pad=3, act="relu")
    x = maxpool_3x3_s2_p1(x)
    for (planes, blocks, stride), layer in zip(ARCH, params["layers"]):
        for bi, blk in enumerate(layer):
            x = bottleneck_forward(x, blk, stride if bi == 0 else 1)
    feats = jnp.mean(x.astype(jnp.float32), axis=(1, 2))      # adaptive avg pool -> (N, 2048)
    return quantized_linear(feats, params["fc"])               # (N, 1000) f32


if __name__ == "__main__":
    key = jax.random.PRNGKey(0)
    k_params, k_input = jax.random.split(key)

    params = make_quantized_resnet50(k_params)

    # Small input consistent with ResNet-50's stride schedule (needs >= 32x32).
    x = jax.random.normal(k_input, (2, 3, 32, 32), jnp.float32)

    logits = quantized_resnet50_forward(params, x)
    logits = jax.block_until_ready(logits)

    assert logits.shape == (2, 1000), logits.shape
    assert logits.dtype == jnp.float32
    assert bool(jnp.all(jnp.isfinite(logits)))
    print("KERNEL_OK")
</pallas_src>

<mosaic_0001>
module attributes {stable_mosaic.version = 11 : i64} {
  func.func @_matmul_kernel(%arg0: i32, %arg1: i32, %arg2: memref<256x147xbf16, #tpu.memory_space<vmem>>, %arg3: memref<147x64xbf16, #tpu.memory_space<vmem>>, %arg4: memref<2x64xf32, #tpu.memory_space<vmem>>, %arg5: memref<256x64xbf16, #tpu.memory_space<vmem>>) attributes {dimension_semantics = [#tpu.dimension_semantics<parallel>, #tpu.dimension_semantics<parallel>], iteration_bounds = array<i64: 2, 1>, scalar_prefetch = 0 : i64, scratch_operands = 0 : i64, tpu.core_type = #tpu.core_type<tc>, window_params = [{transform_indices = @transform_0, window_bounds = array<i64: 256, 147>}, {transform_indices = @transform_1, window_bounds = array<i64: 147, 64>}, {transform_indices = @transform_2, window_bounds = array<i64: 2, 64>}, {transform_indices = @transform_3, window_bounds = array<i64: 256, 64>}]} {
    %c0 = arith.constant 0 : index
    %c0_0 = arith.constant 0 : index
    %0 = vector.load %arg2[%c0, %c0_0] : memref<256x147xbf16, #tpu.memory_space<vmem>>, vector<256x147xbf16>
    %c0_1 = arith.constant 0 : index
    %c0_2 = arith.constant 0 : index
    %1 = vector.load %arg3[%c0_1, %c0_2] : memref<147x64xbf16, #tpu.memory_space<vmem>>, vector<147x64xbf16>
    %cst = arith.constant dense<0.000000e+00> : vector<256x64xf32>
    %2 = tpu.matmul %0, %1, %cst {dimension_numbers = #tpu.dot_dimension_numbers<[1], [0], [0], [1], [0, 0, 1, 1], [], []>} : vector<256x147xbf16>, vector<147x64xbf16>, vector<256x64xf32> -> vector<256x64xf32>
    %c0_3 = arith.constant 0 : index
    %c0_4 = arith.constant 0 : index
    %3 = vector.load %arg4[%c0_3, %c0_4] : memref<2x64xf32, #tpu.memory_space<vmem>>, vector<1x64xf32>
    %4 = vector.broadcast %3 : vector<1x64xf32> to vector<256x64xf32>
    %5 = arith.mulf %2, %4 : vector<256x64xf32>
    %c1 = arith.constant 1 : index
    %c0_5 = arith.constant 0 : index
    %6 = vector.load %arg4[%c1, %c0_5] : memref<2x64xf32, #tpu.memory_space<vmem>>, vector<1x64xf32>
    %7 = vector.broadcast %6 : vector<1x64xf32> to vector<256x64xf32>
    %8 = arith.addf %5, %7 : vector<256x64xf32>
    %cst_6 = arith.constant 0.000000e+00 : f32
    %9 = vector.broadcast %cst_6 : f32 to vector<256x64xf32>
    %10 = arith.maximumf %8, %9 : vector<256x64xf32>
    %11 = arith.truncf %10 : vector<256x64xf32> to vector<256x64xbf16>
    %c0_7 = arith.constant 0 : index
    %c0_8 = arith.constant 0 : index
    %12 = vector.load %arg5[%c0_7, %c0_8] : memref<256x64xbf16, #tpu.memory_space<vmem>>, vector<256x64xbf16>
    tpu.vector_store %arg5[%c0_7, %c0_8], %11 {strides = array<i32>} : memref<256x64xbf16, #tpu.memory_space<vmem>>, vector<256x64xbf16>,
    return
  }
  func.func @transform_0(%arg0: i32, %arg1: i32) -> (i32, i32) {
    %c0_i32 = arith.constant 0 : i32
    %c0_i32_0 = arith.constant 0 : i32
    return %arg0, %c0_i32 : i32, i32
  }
  func.func @transform_1(%arg0: i32, %arg1: i32) -> (i32, i32) {
    %c0_i32 = arith.constant 0 : i32
    %c0_i32_0 = arith.constant 0 : i32
    return %c0_i32, %arg1 : i32, i32
  }
  func.func @transform_2(%arg0: i32, %arg1: i32) -> (i32, i32) {
    %c0_i32 = arith.constant 0 : i32
    %c0_i32_0 = arith.constant 0 : i32
    return %c0_i32, %arg1 : i32, i32
  }
  func.func @transform_3(%arg0: i32, %arg1: i32) -> (i32, i32) {
    %c0_i32 = arith.constant 0 : i32
    return %arg0, %arg1 : i32, i32
  }
}

</mosaic_0001>

<bundles_post_ra>
// kernel: matmul_fused.1
= control target key start
LH: loop header
LB: loop body
LE: loop exit
PB: predicated region body
PF: predicated region fallthrough
CT: control target
= control target key end

     0   :  { %s1362_s12 = smov 0   ;;  %s1364_s13 = smov 0   ;;  %s1619_s0 = inlined_call_operand.vmem [shape: bf16[512,147], index: 0, kind: input, shape index: {}]   ;;  %s1620_s1 = inlined_call_operand.vmem [shape: bf16[147,64], index: 1, kind: input, shape index: {}]   ;;  %s1621_s2 = inlined_call_operand.vmem [shape: f32[2,64], index: 2, kind: input, shape index: {}]   ;;  %s1622_s3 = inlined_call_operand.vmem [shape: bf16[512,64], index: 3, kind: output, shape index: {}]  }
   0x1   :  { %s1366_s14 = smov 0  }
   0x2 LB: > { %s25_s15 = sadd.s32 1, %s1334_s13  ;;  %p1079_p0 = scmp.ge.s32.totalorder %s1338_s14, 1  ;;  %s1338_s14 = sphi %s1366_s14, %s13_s14   ;;  %s1334_s13 = sphi %s1364_s13, %s1624_s13   ;;  %s1330_s12 = sphi %s1362_s12, %s1623_s12  }
   0x3   : > { %p27_p1 = scmp.ge.s32.totalorder %s25_s15, 2  ;;  %p171_p2 = scmp.lt.s32.totalorder %s1338_s14, 3 }
   0x5   : > { %s1626_s15 = smov (%p27_p1, %s25_s15), 0  ;;  %p172_p3 = pnand %p1079_p0, %p171_p2 }
   0x6   : > { %v1258_v0 = vld [vmem:[%s1620_s1] sm:$0xff] (!%p172_p3)   ;;  %v1340_v1 = vmov (!%p172_p3), 0   ;;  %v1259_v2 = vld [vmem:[%s1620_s1 + $0x8] sm:$0xff] (!%p172_p3)   ;;  %v1260_v3 = vld [vmem:[%s1620_s1 + $0x10] sm:$0xff] (!%p172_p3)   ;;  %s1080_s22 = sshll.u32 (!%p172_p3), %s1330_s12, 5  ;;  %vm484_vm0 = vcmask (!%p172_p3), 154624  }
   0x7   : > { %175 = sbr.rel (%p172_p3) target bundleno = 326 (0x146), region = 32  ;;  %540 = vmatprep.subr.bf16.mxu0 (!%p172_p3), %v1340_v1  ;;  %1212 = vmatprep.subr.bf16.mxu1 (!%p172_p3), %v1340_v1  ;;  %p208_p4 = scmp.lt.s32.totalorder (!%p172_p3), %s1080_s22, 63  ;;  %v1261_v4 = vld [vmem:[%s1620_s1 + $0x18] sm:$0xff] (!%p172_p3)   ;;  %v1262_v5 = vld [vmem:[%s1620_s1 + $0x20] sm:$0xff] (!%p172_p3)   ;;  %v1263_v8 = vld [vmem:[%s1620_s1 + $0x28] sm:$0xff] (!%p172_p3)   ;;  %vm533_vm1 = vcmask (!%p172_p3), 1040384  }
   0x8   : > { %541 = vmatpush1.bf16.msra.mxu0 (!%p172_p3), %v1258_v0  ;;  %1222 = vmatpush1.bf16.msra.mxu1 (!%p172_p3), %v1258_v0  ;;  %v1264_v9 = vld [vmem:[%s1620_s1 + $0x30] sm:$0xff] (!%p172_p3)   ;;  %v1265_v10 = vld [vmem:[%s1620_s1 + $0x38] sm:$0xff] (!%p172_p3)   ;;  %vm534_vm2 = vcmask (!%p172_p3), 1041408   ;;  %v1341_v11 = vmov (!%p172_p3), 65535   ;;  %v1266_v13 = vld [vmem:[%s1620_s1 + $0x40] sm:$0xff] (!%p172_p3)   ;;  %vm935_vm3 = vcmask (!%p172_p3), 519168  }
   0x9   : > { %542 = vmatprep.subr.bf16.mxu0 (!%p172_p3), %v1340_v1  ;;  %1213 = vmatprep.subr.bf16.mxu1 (!%p172_p3), %v1340_v1  ;;  %v535_v12 = vsel (!%p172_p3), %vm533_vm1, 4294967295, %v1341_v11  ;;  %v1267_v14 = vld [vmem:[%s1620_s1 + $0x48] ss:$0 sps:$4 sm:$0x33] (!%p172_p3)   ;;  %v1469_v47 = vld [vmem:[%s1621_s2] ss:$0 sm:$0xff] (!%p172_p3) }
   0xa   : > { %v536_v15 = vsel (!%p172_p3), %vm534_vm2, %v535_v12, 0  ;;  %v1474_v49 = vld [vmem:[%s1621_s2 + $0x1] ss:$0 sm:$0xff] (!%p172_p3) }
   0xb   : > { %v538_v16 = vand.u32 (!%p172_p3), %v1267_v14, %v536_v15 }
   0xc   : > { %543 = vmatpush1.bf16.msra.mxu0 (!%p172_p3), %v1259_v2  ;;  %1223 = vmatpush1.bf16.msra.mxu1 (!%p172_p3), %v1259_v2 }
   0xd   : > { %544 = vmatprep.subr.bf16.mxu0 (!%p172_p3), %v1340_v1  ;;  %1214 = vmatprep.subr.bf16.mxu1 (!%p172_p3), %v1340_v1 }
   0xe   : > { %s1628_s22 = smov (!%p208_p4, %s1080_s22), 63 }
   0xf   : > { %s1179_s25 = sshll.u32 %s1628_s22, 3  ;;  %s1084_s21 = sshll.u32 %s1628_s22, 2 }
  0x10   : > { %545 = vmatpush1.bf16.msra.mxu0 %v1260_v3  ;;  %1224 = vmatpush1.bf16.msra.mxu1 %v1260_v3  ;;  %s1398_s28 = scalar_lea.vmem %s1619_s0, %s1179_s25  ;;  %s1488_s22 = scalar_lea.vmem %s1622_s3, %s1084_s21 }
  0x11   : > { %546 = vmatprep.subr.bf16.mxu0 %v1340_v1  ;;  %1215 = vmatprep.subr.bf16.mxu1 %v1340_v1  ;;  %v1270_v6 = vld [vmem:[%s1398_s28 + $0x4] ss:$8 sps:$4 sm:$0xff]   ;;  %v1268_v17 = vld [vmem:[%s1398_s28] ss:$8 sps:$4 sm:$0xff]   ;;  %v1274_v19 = vld [vmem:[%s1398_s28 + $0x14] ss:$8 sps:$4 sm:$0xff]  }
  0x12   : > { %v1273_v7 = vld [vmem:[%s1398_s28 + $0x84] ss:$8 sps:$4 sm:$0xff]   ;;  %1127 = vmatprep.mubr.msk.bf16.mxu0 %vm484_vm0, %v1270_v6  ;;  %v1271_v18 = vld [vmem:[%s1398_s28 + $0x80] ss:$8 sps:$4 sm:$0xff]   ;;  %v1276_v20 = vld [vmem:[%s1398_s28 + $0x94] ss:$8 sps:$4 sm:$0xff]  }
  0x13   : > { %1135 = vmatprep.mubr.msk.bf16.mxu1 %vm484_vm0, %v1273_v7  ;;  %v1278_v21 = vld [vmem:[%s1398_s28 + $0x10] ss:$8 sps:$4 sm:$0xff]   ;;  %v1280_v23 = vld [vmem:[%s1398_s28 + $0x24] ss:$8 sps:$4 sm:$0xff]   ;;  %v1284_v25 = vld [vmem:[%s1398_s28 + $0x20] ss:$8 sps:$4 sm:$0xff]  }
  0x14   : > { %547 = vmatpush1.bf16.msra.mxu0 %v1261_v4  ;;  %1225 = vmatpush1.bf16.msra.mxu1 %v1261_v4  ;;  %v1279_v22 = vld [vmem:[%s1398_s28 + $0x90] ss:$8 sps:$4 sm:$0xff]   ;;  %v1282_v24 = vld [vmem:[%s1398_s28 + $0xa4] ss:$8 sps:$4 sm:$0xff]   ;;  %v1285_v26 = vld [vmem:[%s1398_s28 + $0xa0] ss:$8 sps:$4 sm:$0xff]  }
  0x15   : > { %548 = vmatprep.subr.bf16.mxu0 %v1340_v1  ;;  %1216 = vmatprep.subr.bf16.mxu1 %v1340_v1  ;;  %v1286_v27 = vld [vmem:[%s1398_s28 + $0x34] ss:$8 sps:$4 sm:$0xff]   ;;  %v1290_v29 = vld [vmem:[%s1398_s28 + $0x30] ss:$8 sps:$4 sm:$0xff]   ;;  %v1292_v31 = vld [vmem:[%s1398_s28 + $0x44] ss:$8 sps:$4 sm:$0xff]  }
  0x16   : > { %v1288_v28 = vld [vmem:[%s1398_s28 + $0xb4] ss:$8 sps:$4 sm:$0xff]   ;;  %v1291_v30 = vld [vmem:[%s1398_s28 + $0xb0] ss:$8 sps:$4 sm:$0xff]   ;;  %v1294_v32 = vld [vmem:[%s1398_s28 + $0xc4] ss:$8 sps:$4 sm:$0xff]  }
  0x17   : > { %v1296_v33 = vld [vmem:[%s1398_s28 + $0x40] ss:$8 sps:$4 sm:$0xff]   ;;  %v1298_v35 = vld [vmem:[%s1398_s28 + $0x54] ss:$8 sps:$4 sm:$0xff]   ;;  %v1302_v37 = vld [vmem:[%s1398_s28 + $0x50] ss:$8 sps:$4 sm:$0xff]  }
  0x18   : > { %549 = vmatpush1.bf16.msra.mxu0 %v1262_v5  ;;  %1226 = vmatpush1.bf16.msra.mxu1 %v1262_v5  ;;  %v1297_v34 = vld [vmem:[%s1398_s28 + $0xc0] ss:$8 sps:$4 sm:$0xff]   ;;  %v1300_v36 = vld [vmem:[%s1398_s28 + $0xd4] ss:$8 sps:$4 sm:$0xff]   ;;  %v1303_v38 = vld [vmem:[%s1398_s28 + $0xd0] ss:$8 sps:$4 sm:$0xff]  }
  0x19   : > { %550 = vmatprep.subr.bf16.mxu0 %v1340_v1  ;;  %1217 = vmatprep.subr.bf16.mxu1 %v1340_v1  ;;  %v1304_v39 = vld [vmem:[%s1398_s28 + $0x64] ss:$8 sps:$4 sm:$0xff]   ;;  %v1308_v41 = vld [vmem:[%s1398_s28 + $0x60] ss:$8 sps:$4 sm:$0xff]   ;;  %v1310_v43 = vld [vmem:[%s1398_s28 + $0x74] ss:$8 sps:$4 sm:$0xff]  }
  0x1a   : > { %v1306_v40 = vld [vmem:[%s1398_s28 + $0xe4] ss:$8 sps:$4 sm:$0xff]   ;;  %v1309_v42 = vld [vmem:[%s1398_s28 + $0xe0] ss:$8 sps:$4 sm:$0xff]   ;;  %v1312_v44 = vld [vmem:[%s1398_s28 + $0xf4] ss:$8 sps:$4 sm:$0xff]  }
  0x1b   : > { %v1314_v45 = vld [vmem:[%s1398_s28 + $0x70] ss:$8 sps:$4 sm:$0xff]  }
  0x1c   : > { %551 = vmatpush1.bf16.msra.mxu0 %v1263_v8  ;;  %1227 = vmatpush1.bf16.msra.mxu1 %v1263_v8  ;;  %v1315_v46 = vld [vmem:[%s1398_s28 + $0xf0] ss:$8 sps:$4 sm:$0xff]  }
  0x1d   : > { %552 = vmatprep.subr.bf16.mxu0 %v1340_v1  ;;  %1218 = vmatprep.subr.bf16.mxu1 %v1340_v1 }
  0x20   : > { %553 = vmatpush1.bf16.msra.mxu0 %v1264_v9  ;;  %1228 = vmatpush1.bf16.msra.mxu1 %v1264_v9 }
  0x21   : > { %554 = vmatprep.subr.bf16.mxu0 %v1340_v1  ;;  %1219 = vmatprep.subr.bf16.mxu1 %v1340_v1 }
  0x24   : > { %555 = vmatpush1.bf16.msra.mxu0 %v1265_v10  ;;  %1229 = vmatpush1.bf16.msra.mxu1 %v1265_v10 }
  0x25   : > { %556 = vmatprep.subr.bf16.mxu0 %v1340_v1  ;;  %1220 = vmatprep.subr.bf16.mxu1 %v1340_v1 }
  0x28   : > { %557 = vmatpush1.bf16.msra.mxu0 %v1266_v13  ;;  %1230 = vmatpush1.bf16.msra.mxu1 %v1266_v13 }
  0x29   : > { %558 = vmatprep.subr.bf16.mxu0 %v1340_v1  ;;  %1221 = vmatprep.subr.bf16.mxu1 %v1340_v1 }
  0x2c   : > { %559 = vmatpush1.bf16.msra.mxu0 %v538_v16  ;;  %1231 = vmatpush1.bf16.msra.mxu1 %v538_v16 }
  0x2f   : > { %573 = vmatmul.mubr.bf16.vlgmr.msra.gmra.mrb[0].mxu0 %v1268_v17  ;;  %637 = vmatmul.mubr.bf16.vlgmr.msra.gmra.mrb[0].mxu1 %v1271_v18 }
  0x30   : > { %1128 = vmatprep.mubr.msk.bf16.mxu0 %vm484_vm0, %v1274_v19  ;;  %1136 = vmatprep.mubr.msk.bf16.mxu1 %vm484_vm0, %v1276_v20 }
  0x37   : > { %581 = vmatmul.mubr.bf16.gmra.mrb[4].mxu0 %v1278_v21  ;;  %645 = vmatmul.mubr.bf16.gmra.mrb[4].mxu1 %v1279_v22 }
  0x38   : > { %1129 = vmatprep.mubr.msk.bf16.mxu0 %vm484_vm0, %v1280_v23  ;;  %1137 = vmatprep.mubr.msk.bf16.mxu1 %vm484_vm0, %v1282_v24 }
  0x3f   : > { %589 = vmatmul.mubr.bf16.gmra.mrb[8].mxu0 %v1284_v25  ;;  %653 = vmatmul.mubr.bf16.gmra.mrb[8].mxu1 %v1285_v26 }
  0x40   : > { %1130 = vmatprep.mubr.msk.bf16.mxu0 %vm484_vm0, %v1286_v27  ;;  %1138 = vmatprep.mubr.msk.bf16.mxu1 %vm484_vm0, %v1288_v28 }
  0x47   : > { %597 = vmatmul.mubr.bf16.gmra.mrb[12].mxu0 %v1290_v29  ;;  %661 = vmatmul.mubr.bf16.gmra.mrb[12].mxu1 %v1291_v30 }
  0x48   : > { %1131 = vmatprep.mubr.msk.bf16.mxu0 %vm484_vm0, %v1292_v31  ;;  %1139 = vmatprep.mubr.msk.bf16.mxu1 %vm484_vm0, %v1294_v32 }
  0x4f   : > { %605 = vmatmul.mubr.bf16.gmra.mrb[16].mxu0 %v1296_v33  ;;  %669 = vmatmul.mubr.bf16.gmra.mrb[16].mxu1 %v1297_v34 }
  0x50   : > { %1132 = vmatprep.mubr.msk.bf16.mxu0 %vm484_vm0, %v1298_v35  ;;  %1140 = vmatprep.mubr.msk.bf16.mxu1 %vm484_vm0, %v1300_v36 }
  0x57   : > { %613 = vmatmul.mubr.bf16.gmra.mrb[20].mxu0 %v1302_v37  ;;  %677 = vmatmul.mubr.bf16.gmra.mrb[20].mxu1 %v1303_v38 }
  0x58   : > { %1133 = vmatprep.mubr.msk.bf16.mxu0 %vm484_vm0, %v1304_v39  ;;  %1141 = vmatprep.mubr.msk.bf16.mxu1 %vm484_vm0, %v1306_v40 }
  0x5f   : > { %621 = vmatmul.mubr.bf16.gmra.mrb[24].mxu0 %v1308_v41  ;;  %685 = vmatmul.mubr.bf16.gmra.mrb[24].mxu1 %v1309_v42 }
  0x60   : > { %1134 = vmatprep.mubr.msk.bf16.mxu0 %vm484_vm0, %v1310_v43  ;;  %1142 = vmatprep.mubr.msk.bf16.mxu1 %vm484_vm0, %v1312_v44 }
  0x67   : > { %629 = vmatmul.mubr.bf16.gmra.mrb[28].mxu0 %v1314_v45  ;;  %693 = vmatmul.mubr.bf16.gmra.mrb[28].mxu1 %v1315_v46 }
 0x102   : > { %v574_v48 = vpop.f32.mrb[0].mxu0  ;;  %v638_v50 = vpop.f32.mrb[0].mxu1 }
 0x103   : > { %v706_v51 = vmul.f32 %v1469_v47, %v574_v48  ;;  %v722_v52 = vmul.f32 %v1469_v47, %v638_v50  ;;  %v576_v53 = vpop.f32.mrb[1].mxu0  ;;  %v640_v54 = vpop.f32.mrb[1].mxu1 }
 0x104   : > { %v577_v55 = vpop.f32.mrb[2].mxu0  ;;  %v641_v56 = vpop.f32.mrb[2].mxu1 }
 0x105   : > { %v743_v57 = vadd.f32 %v1474_v49, %v706_v51  ;;  %v759_v58 = vadd.f32 %v1474_v49, %v722_v52  ;;  %v707_v59 = vmul.f32 %v1469_v47, %v577_v55  ;;  %v723_v60 = vmul.f32 %v1469_v47, %v641_v56  ;;  %v579_v61 = vpop.f32.mrb[3].mxu0  ;;  %v643_v62 = vpop.f32.mrb[3].mxu1 }
 0x107   : > { %v775_v63 = vmax.f32 %v743_v57, 0.0  ;;  %v791_v0 = vmax.f32 %v759_v58, 0.0  ;;  %v744_v1 = vadd.f32 %v1474_v49, %v707_v59  ;;  %v760_v2 = vadd.f32 %v1474_v49, %v723_v60 }
 0x109   : > { %v1180_v3 = vpack.c.bf16 %v775_v63, %v775_v63  ;;  %v1196_v4 = vpack.c.bf16 %v791_v0, %v791_v0  ;;  %v776_v5 = vmax.f32 %v744_v1, 0.0  ;;  %v792_v6 = vmax.f32 %v760_v2, 0.0 }
 0x10a   : > { %v582_v7 = vpop.f32.mrb[4].mxu0  ;;  %v646_v8 = vpop.f32.mrb[4].mxu1 }
 0x10b   : > { %936 = vst.msk [vmem:[%s1488_s22] sm:$0xf] %vm935_vm3, %v1180_v3  ;;  %952 = vst.msk [vmem:[%s1488_s22 + $0x40] sm:$0xf] %vm935_vm3, %v1196_v4  ;;  %v1181_v9 = vpack.c.bf16 %v776_v5, %v776_v5  ;;  %v1197_v10 = vpack.c.bf16 %v792_v6, %v792_v6  ;;  %v708_v11 = vmul.f32 %v1469_v47, %v582_v7  ;;  %v584_v13 = vpop.f32.mrb[5].mxu0  ;;  %v648_v14 = vpop.f32.mrb[5].mxu1 }
 0x10c   : > { %v724_v12 = vmul.f32 %v1469_v47, %v646_v8  ;;  %v585_v15 = vpop.f32.mrb[6].mxu0  ;;  %v649_v16 = vpop.f32.mrb[6].mxu1 }
 0x10d   : > { %937 = vst.msk [vmem:[%s1488_s22 + $0x4] sm:$0xf] %vm935_vm3, %v1181_v9  ;;  %953 = vst.msk [vmem:[%s1488_s22 + $0x44] sm:$0xf] %vm935_vm3, %v1197_v10  ;;  %v745_v17 = vadd.f32 %v1474_v49, %v708_v11  ;;  %v709_v19 = vmul.f32 %v1469_v47, %v585_v15  ;;  %v725_v20 = vmul.f32 %v1469_v47, %v649_v16  ;;  %v587_v21 = vpop.f32.mrb[7].mxu0  ;;  %v651_v22 = vpop.f32.mrb[7].mxu1 }
 0x10e   : > { %v761_v18 = vadd.f32 %v1474_v49, %v724_v12 }
 0x10f   : > { %v777_v23 = vmax.f32 %v745_v17, 0.0  ;;  %v746_v25 = vadd.f32 %v1474_v49, %v709_v19  ;;  %v762_v26 = vadd.f32 %v1474_v49, %v725_v20 }
 0x110   : > { %v793_v24 = vmax.f32 %v761_v18, 0.0 }
 0x111   : > { %v1182_v27 = vpack.c.bf16 %v777_v23, %v777_v23  ;;  %v778_v29 = vmax.f32 %v746_v25, 0.0  ;;  %v794_v30 = vmax.f32 %v762_v26, 0.0 }
 0x112   : > { %v1198_v28 = vpack.c.bf16 %v793_v24, %v793_v24  ;;  %v590_v31 = vpop.f32.mrb[8].mxu0  ;;  %v654_v32 = vpop.f32.mrb[8].mxu1 }
 0x113   : > { %938 = vst.msk [vmem:[%s1488_s22 + $0x8] sm:$0xf] %vm935_vm3, %v1182_v27  ;;  %v1183_v33 = vpack.c.bf16 %v778_v29, %v778_v29  ;;  %v1199_v34 = vpack.c.bf16 %v794_v30, %v794_v30  ;;  %v710_v35 = vmul.f32 %v1469_v47, %v590_v31  ;;  %v726_v36 = vmul.f32 %v1469_v47, %v654_v32  ;;  %v592_v37 = vpop.f32.mrb[9].mxu0  ;;  %v656_v38 = vpop.f32.mrb[9].mxu1 }
 0x114   : > { %954 = vst.msk [vmem:[%s1488_s22 + $0x48] sm:$0xf] %vm935_vm3, %v1198_v28  ;;  %v593_v39 = vpop.f32.mrb[10].mxu0  ;;  %v657_v40 = vpop.f32.mrb[10].mxu1 }
 0x115   : > { %939 = vst.msk [vmem:[%s1488_s22 + $0xc] sm:$0xf] %vm935_vm3, %v1183_v33  ;;  %955 = vst.msk [vmem:[%s1488_s22 + $0x4c] sm:$0xf] %vm935_vm3, %v1199_v34  ;;  %v747_v41 = vadd.f32 %v1474_v49, %v710_v35  ;;  %v763_v42 = vadd.f32 %v1474_v49, %v726_v36  ;;  %v711_v43 = vmul.f32 %v1469_v47, %v593_v39  ;;  %v595_v45 = vpop.f32.mrb[11].mxu0  ;;  %v659_v46 = vpop.f32.mrb[11].mxu1 }
 0x116   : > { %v727_v44 = vmul.f32 %v1469_v47, %v657_v40 }
 0x117   : > { %v779_v48 = vmax.f32 %v747_v41, 0.0  ;;  %v795_v50 = vmax.f32 %v763_v42, 0.0  ;;  %v748_v51 = vadd.f32 %v1474_v49, %v711_v43 }
 0x118   : > { %v764_v52 = vadd.f32 %v1474_v49, %v727_v44 }
 0x119   : > { %v1184_v53 = vpack.c.bf16 %v779_v48, %v779_v48  ;;  %v1200_v54 = vpack.c.bf16 %v795_v50, %v795_v50  ;;  %v780_v55 = vmax.f32 %v748_v51, 0.0 }
 0x11a   : > { %v796_v56 = vmax.f32 %v764_v52, 0.0  ;;  %v598_v57 = vpop.f32.mrb[12].mxu0  ;;  %v662_v58 = vpop.f32.mrb[12].mxu1 }
 0x11b   : > { %940 = vst.msk [vmem:[%s1488_s22 + $0x10] sm:$0xf] %vm935_vm3, %v1184_v53  ;;  %956 = vst.msk [vmem:[%s1488_s22 + $0x50] sm:$0xf] %vm935_vm3, %v1200_v54  ;;  %v1185_v59 = vpack.c.bf16 %v780_v55, %v780_v55  ;;  %v712_v61 = vmul.f32 %v1469_v47, %v598_v57  ;;  %v728_v62 = vmul.f32 %v1469_v47, %v662_v58  ;;  %v600_v63 = vpop.f32.mrb[13].mxu0  ;;  %v664_v0 = vpop.f32.mrb[13].mxu1 }
 0x11c   : > { %v1201_v60 = vpack.c.bf16 %v796_v56, %v796_v56  ;;  %v601_v1 = vpop.f32.mrb[14].mxu0  ;;  %v665_v2 = vpop.f32.mrb[14].mxu1 }
 0x11d   : > { %941 = vst.msk [vmem:[%s1488_s22 + $0x14] sm:$0xf] %vm935_vm3, %v1185_v59  ;;  %v749_v3 = vadd.f32 %v1474_v49, %v712_v61  ;;  %v765_v4 = vadd.f32 %v1474_v49, %v728_v62  ;;  %v713_v5 = vmul.f32 %v1469_v47, %v601_v1  ;;  %v729_v6 = vmul.f32 %v1469_v47, %v665_v2  ;;  %v603_v7 = vpop.f32.mrb[15].mxu0  ;;  %v667_v8 = vpop.f32.mrb[15].mxu1 }
 0x11e   : > { %957 = vst.msk [vmem:[%s1488_s22 + $0x54] sm:$0xf] %vm935_vm3, %v1201_v60 }
 0x11f   : > { %v781_v9 = vmax.f32 %v749_v3, 0.0  ;;  %v797_v10 = vmax.f32 %v765_v4, 0.0  ;;  %v750_v11 = vadd.f32 %v1474_v49, %v713_v5  ;;  %v766_v12 = vadd.f32 %v1474_v49, %v729_v6 }
 0x121   : > { %v1186_v13 = vpack.c.bf16 %v781_v9, %v781_v9  ;;  %v1202_v14 = vpack.c.bf16 %v797_v10, %v797_v10  ;;  %v782_v15 = vmax.f32 %v750_v11, 0.0  ;;  %v798_v16 = vmax.f32 %v766_v12, 0.0 }
 0x122   : > { %v606_v17 = vpop.f32.mrb[16].mxu0  ;;  %v670_v18 = vpop.f32.mrb[16].mxu1 }
 0x123   : > { %942 = vst.msk [vmem:[%s1488_s22 + $0x18] sm:$0xf] %vm935_vm3, %v1186_v13  ;;  %958 = vst.msk [vmem:[%s1488_s22 + $0x58] sm:$0xf] %vm935_vm3, %v1202_v14  ;;  %v1187_v19 = vpack.c.bf16 %v782_v15, %v782_v15  ;;  %v1203_v20 = vpack.c.bf16 %v798_v16, %v798_v16  ;;  %v714_v21 = vmul.f32 %v1469_v47, %v606_v17  ;;  %v608_v23 = vpop.f32.mrb[17].mxu0  ;;  %v672_v24 = vpop.f32.mrb[17].mxu1 }
 0x124   : > { %v730_v22 = vmul.f32 %v1469_v47, %v670_v18  ;;  %v609_v25 = vpop.f32.mrb[18].mxu0  ;;  %v673_v26 = vpop.f32.mrb[18].mxu1 }
 0x125   : > { %943 = vst.msk [vmem:[%s1488_s22 + $0x1c] sm:$0xf] %vm935_vm3, %v1187_v19  ;;  %959 = vst.msk [vmem:[%s1488_s22 + $0x5c] sm:$0xf] %vm935_vm3, %v1203_v20  ;;  %v751_v27 = vadd.f32 %v1474_v49, %v714_v21  ;;  %v715_v29 = vmul.f32 %v1469_v47, %v609_v25  ;;  %v731_v30 = vmul.f32 %v1469_v47, %v673_v26  ;;  %v611_v31 = vpop.f32.mrb[19].mxu0  ;;  %v675_v32 = vpop.f32.mrb[19].mxu1 }
 0x126   : > { %v767_v28 = vadd.f32 %v1474_v49, %v730_v22 }
 0x127   : > { %v783_v33 = vmax.f32 %v751_v27, 0.0  ;;  %v752_v35 = vadd.f32 %v1474_v49, %v715_v29  ;;  %v768_v36 = vadd.f32 %v1474_v49, %v731_v30 }
 0x128   : > { %v799_v34 = vmax.f32 %v767_v28, 0.0 }
 0x129   : > { %v1188_v37 = vpack.c.bf16 %v783_v33, %v783_v33  ;;  %v784_v39 = vmax.f32 %v752_v35, 0.0  ;;  %v800_v40 = vmax.f32 %v768_v36, 0.0 }
 0x12a   : > { %v1204_v38 = vpack.c.bf16 %v799_v34, %v799_v34  ;;  %v614_v41 = vpop.f32.mrb[20].mxu0  ;;  %v678_v42 = vpop.f32.mrb[20].mxu1 }
 0x12b   : > { %944 = vst.msk [vmem:[%s1488_s22 + $0x20] sm:$0xf] %vm935_vm3, %v1188_v37  ;;  %v1189_v43 = vpack.c.bf16 %v784_v39, %v784_v39  ;;  %v1205_v44 = vpack.c.bf16 %v800_v40, %v800_v40  ;;  %v716_v45 = vmul.f32 %v1469_v47, %v614_v41  ;;  %v732_v46 = vmul.f32 %v1469_v47, %v678_v42  ;;  %v616_v48 = vpop.f32.mrb[21].mxu0  ;;  %v680_v50 = vpop.f32.mrb[21].mxu1 }
 0x12c   : > { %960 = vst.msk [vmem:[%s1488_s22 + $0x60] sm:$0xf] %vm935_vm3, %v1204_v38  ;;  %v617_v51 = vpop.f32.mrb[22].mxu0  ;;  %v681_v52 = vpop.f32.mrb[22].mxu1 }
 0x12d   : > { %945 = vst.msk [vmem:[%s1488_s22 + $0x24] sm:$0xf] %vm935_vm3, %v1189_v43  ;;  %961 = vst.msk [vmem:[%s1488_s22 + $0x64] sm:$0xf] %vm935_vm3, %v1205_v44  ;;  %v753_v53 = vadd.f32 %v1474_v49, %v716_v45  ;;  %v769_v54 = vadd.f32 %v1474_v49, %v732_v46  ;;  %v717_v55 = vmul.f32 %v1469_v47, %v617_v51  ;;  %v619_v57 = vpop.f32.mrb[23].mxu0  ;;  %v683_v58 = vpop.f32.mrb[23].mxu1 }
 0x12e   : > { %v733_v56 = vmul.f32 %v1469_v47, %v681_v52 }
 0x12f   : > { %v785_v59 = vmax.f32 %v753_v53, 0.0  ;;  %v801_v60 = vmax.f32 %v769_v54, 0.0  ;;  %v754_v61 = vadd.f32 %v1474_v49, %v717_v55 }
 0x130   : > { %v770_v62 = vadd.f32 %v1474_v49, %v733_v56 }
 0x131   : > { %v1190_v63 = vpack.c.bf16 %v785_v59, %v785_v59  ;;  %v1206_v0 = vpack.c.bf16 %v801_v60, %v801_v60  ;;  %v786_v1 = vmax.f32 %v754_v61, 0.0 }
 0x132   : > { %v802_v2 = vmax.f32 %v770_v62, 0.0  ;;  %v622_v3 = vpop.f32.mrb[24].mxu0  ;;  %v686_v4 = vpop.f32.mrb[24].mxu1 }
 0x133   : > { %946 = vst.msk [vmem:[%s1488_s22 + $0x28] sm:$0xf] %vm935_vm3, %v1190_v63  ;;  %962 = vst.msk [vmem:[%s1488_s22 + $0x68] sm:$0xf] %vm935_vm3, %v1206_v0  ;;  %v1191_v5 = vpack.c.bf16 %v786_v1, %v786_v1  ;;  %v718_v7 = vmul.f32 %v1469_v47, %v622_v3  ;;  %v734_v8 = vmul.f32 %v1469_v47, %v686_v4  ;;  %v624_v9 = vpop.f32.mrb[25].mxu0  ;;  %v688_v10 = vpop.f32.mrb[25].mxu1 }
 0x134   : > { %v1207_v6 = vpack.c.bf16 %v802_v2, %v802_v2  ;;  %v625_v11 = vpop.f32.mrb[26].mxu0  ;;  %v689_v12 = vpop.f32.mrb[26].mxu1 }
 0x135   : > { %947 = vst.msk [vmem:[%s1488_s22 + $0x2c] sm:$0xf] %vm935_vm3, %v1191_v5  ;;  %v755_v13 = vadd.f32 %v1474_v49, %v718_v7  ;;  %v771_v14 = vadd.f32 %v1474_v49, %v734_v8  ;;  %v719_v15 = vmul.f32 %v1469_v47, %v625_v11  ;;  %v735_v16 = vmul.f32 %v1469_v47, %v689_v12  ;;  %v627_v17 = vpop.f32.mrb[27].mxu0  ;;  %v691_v18 = vpop.f32.mrb[27].mxu1 }
 0x136   : > { %963 = vst.msk [vmem:[%s1488_s22 + $0x6c] sm:$0xf] %vm935_vm3, %v1207_v6 }
 0x137   : > { %v787_v19 = vmax.f32 %v755_v13, 0.0  ;;  %v803_v20 = vmax.f32 %v771_v14, 0.0  ;;  %v756_v21 = vadd.f32 %v1474_v49, %v719_v15  ;;  %v772_v22 = vadd.f32 %v1474_v49, %v735_v16 }
 0x139   : > { %v1192_v23 = vpack.c.bf16 %v787_v19, %v787_v19  ;;  %v1208_v24 = vpack.c.bf16 %v803_v20, %v803_v20  ;;  %v788_v25 = vmax.f32 %v756_v21, 0.0  ;;  %v804_v26 = vmax.f32 %v772_v22, 0.0 }
 0x13a   : > { %v630_v27 = vpop.f32.mrb[28].mxu0  ;;  %v694_v28 = vpop.f32.mrb[28].mxu1 }
 0x13b   : > { %948 = vst.msk [vmem:[%s1488_s22 + $0x30] sm:$0xf] %vm935_vm3, %v1192_v23  ;;  %964 = vst.msk [vmem:[%s1488_s22 + $0x70] sm:$0xf] %vm935_vm3, %v1208_v24  ;;  %v1193_v29 = vpack.c.bf16 %v788_v25, %v788_v25  ;;  %v1209_v30 = vpack.c.bf16 %v804_v26, %v804_v26  ;;  %v720_v31 = vmul.f32 %v1469_v47, %v630_v27  ;;  %v632_v33 = vpop.f32.mrb[29].mxu0  ;;  %v696_v34 = vpop.f32.mrb[29].mxu1 }
 0x13c   : > { %v736_v32 = vmul.f32 %v1469_v47, %v694_v28  ;;  %v633_v35 = vpop.f32.mrb[30].mxu0  ;;  %v697_v36 = vpop.f32.mrb[30].mxu1 }
 0x13d   : > { %949 = vst.msk [vmem:[%s1488_s22 + $0x34] sm:$0xf] %vm935_vm3, %v1193_v29  ;;  %965 = vst.msk [vmem:[%s1488_s22 + $0x74] sm:$0xf] %vm935_vm3, %v1209_v30  ;;  %v757_v37 = vadd.f32 %v1474_v49, %v720_v31  ;;  %v721_v39 = vmul.f32 %v1469_v47, %v633_v35  ;;  %v737_v40 = vmul.f32 %v1469_v47, %v697_v36  ;;  %v635_v41 = vpop.f32.mrb[31].mxu0  ;;  %v699_v42 = vpop.f32.mrb[31].mxu1 }
 0x13e   : > { %v773_v38 = vadd.f32 %v1474_v49, %v736_v32 }
 0x13f   : > { %v789_v43 = vmax.f32 %v757_v37, 0.0  ;;  %v758_v45 = vadd.f32 %v1474_v49, %v721_v39  ;;  %v774_v46 = vadd.f32 %v1474_v49, %v737_v40 }
 0x140   : > { %v805_v44 = vmax.f32 %v773_v38, 0.0 }
 0x141   : > { %v1194_v48 = vpack.c.bf16 %v789_v43, %v789_v43  ;;  %v790_v51 = vmax.f32 %v758_v45, 0.0  ;;  %v806_v52 = vmax.f32 %v774_v46, 0.0 }
 0x142   : > { %v1210_v50 = vpack.c.bf16 %v805_v44, %v805_v44 }
 0x143   : > { %950 = vst.msk [vmem:[%s1488_s22 + $0x38] sm:$0xf] %vm935_vm3, %v1194_v48  ;;  %v1195_v53 = vpack.c.bf16 %v790_v51, %v790_v51  ;;  %v1211_v54 = vpack.c.bf16 %v806_v52, %v806_v52 }
 0x144   : > { %966 = vst.msk [vmem:[%s1488_s22 + $0x78] sm:$0xf] %vm935_vm3, %v1210_v50 }
 0x145   : > { %951 = vst.msk [vmem:[%s1488_s22 + $0x3c] sm:$0xf] %vm935_vm3, %v1195_v53  ;;  %967 = vst.msk [vmem:[%s1488_s22 + $0x7c] sm:$0xf] %vm935_vm3, %v1211_v54 }
 0x146 PF: > { %s13_s14 = sadd.s32 1, %s1338_s14   ;;  %s1623_s12 = smov %s1334_s13 }
 0x147   : > { %p10_p5 = scmp.ge.s32.totalorder %s13_s14, 4   ;;  %s1624_s13 = smov %s1626_s15 }
 0x149   :  { %12 = sbr.rel (!%p10_p5) target bundleno = 2 (0x2), region = 68 }

</bundles_post_ra>
